<compile_context>
chip_gen: v7x
topology: tpu7x:2x2x1
jax: 0.10.0
libtpu: 0.0.40
codegen_flags: <defaults>
</compile_context>

<pallas_src>
from dataclasses import dataclass, field
import numpy as np

import jax
import jax.numpy as jnp
from jax.experimental import pallas as pl
from jax.experimental.pallas import tpu as pltpu


# ----------------------------- FrameParams (no torch) -----------------------------
@dataclass
class FrameParams:
    window_sec: float
    overlap: float = field(init=True, repr=False)
    freq_bins: int = 0
    fs: int = 0
    hop_sec: float = field(init=False, repr=True, default=0.0)
    window_sa: int = field(init=False, repr=True, default=0)
    hop_sa: int = field(init=False, repr=True, default=0)

    def __post_init__(self):
        self.hop_sec = self.window_sec * (1 - self.overlap)
        self.window_sa = int(self.window_sec * self.fs)
        self.hop_sa = int(self.hop_sec * self.fs)


# --------------------- deterministic nnAudio STFT basis (buffers) -----------------
def make_stft_kernels(n_fft: int, freq_bins: int, sr: int,
                      fmin: float = 50.0, fmax: float = 6000.0):
    """Replicates nnAudio create_fourier_kernels(freq_scale='linear', window='hann')."""
    s = np.arange(n_fft, dtype=np.float64)
    start_bin = fmin * n_fft / sr
    scaling_ind = (fmax - fmin) * (n_fft / sr) / freq_bins
    k = np.arange(freq_bins, dtype=np.float64)
    bins = k * scaling_ind + start_bin                       # (F,) in DFT-bin units
    ang = 2.0 * np.pi * bins[:, None] * s[None, :] / n_fft   # (F, n_fft)
    window = 0.5 - 0.5 * np.cos(2.0 * np.pi * s / n_fft)     # periodic Hann (fftbins=True)
    wcos = (np.cos(ang) * window).astype(np.float32)
    wsin = (np.sin(ang) * window).astype(np.float32)
    return wcos, wsin


def _round_up(x: int, m: int) -> int:
    return ((x + m - 1) // m) * m


# ----------------------------- in-kernel math helpers ------------------------------
def _atan2_f32(y, x):
    """float32 atan2 from ops guaranteed to lower on Mosaic (abs/where/div/mul/add):
    octant reduction + Cephes atanf polynomial (max err ~2e-7 rad)."""
    pi = 3.141592653589793
    abs_y = jnp.abs(y)
    abs_x = jnp.abs(x)
    swap = abs_y > abs_x
    num = jnp.where(swap, abs_x, abs_y)
    den = jnp.where(swap, abs_y, abs_x)
    a = num / jnp.where(den == 0.0, 1.0, den)            # in [0, 1]
    hi = a > 0.41421356237309503                          # tan(pi/8)
    a = jnp.where(hi, (a - 1.0) / (a + 1.0), a)
    z = a * a
    p = (((8.05374449538e-2 * z - 1.38776856032e-1) * z
          + 1.99777106478e-1) * z - 3.33329491539e-1) * z * a + a
    r = jnp.where(hi, pi / 4 + p, p)
    r = jnp.where(swap, pi / 2 - r, r)
    r = jnp.where(x < 0.0, pi - r, r)
    r = jnp.where(y < 0.0, -r, r)
    return r


# --------------------------------- Pallas kernels ----------------------------------
def _stft_fused_kernel(frames_ref, wT_ref, out_ref):
    # frames_ref: (T_TILE, n_fft); wT_ref: (n_fft, 2F) = [wcos^T | -wsin^T]
    # out_ref:    (T_TILE, 2F)  -> cols [0,F) = Re, cols [F,2F) = Im  (nnAudio imag = -sin conv)
    out_ref[...] = jnp.dot(frames_ref[...], wT_ref[...],
                           preferred_element_type=jnp.float32).astype(out_ref.dtype)


def _abs_arg_ratio_kernel(frames_ref, wT_ref, out_ref):
    # frames_ref: (2, T_TILE, n_fft); wT_ref: (n_fft, 2F) = [wcos^T | +wsin^T]
    # out_ref:    (T_TILE, 2F) -> cols [0,F) = magnitude ratio, cols [F,2F) = phase diff
    two, t, n = frames_ref.shape
    # fold both mics into one lane/sublane-dense MXU call: (2*T_TILE, n_fft) @ (n_fft, 2F)
    cs = jnp.dot(frames_ref[...].reshape(two * t, n), wT_ref[...],
                 preferred_element_type=jnp.float32)
    F = cs.shape[1] // 2
    l_re, l_s = cs[:t, :F], cs[:t, F:]          # left mic:  cos conv, sin conv
    r_re, r_s = cs[t:, :F], cs[t:, F:]          # right mic: cos conv, sin conv

    eps = 1e-08
    mag_l = jnp.sqrt(l_re * l_re + l_s * l_s)
    mag_r = jnp.sqrt(r_re * r_re + r_s * r_s)
    # divide -> EUP reciprocal (free slot once MXU work is fused)
    ratio = mag_r * pl.reciprocal(mag_l + eps, approx=True)

    # nnAudio imag = -sin_conv, torch does atan2(-im, re) == atan2(sin_conv, re)
    pdiff = _atan2_f32(r_s, r_re) - _atan2_f32(l_s, l_re)

    out_ref[...] = jnp.concatenate([ratio, pdiff], axis=1).astype(out_ref.dtype)


# --------------------------------- module wrapper -----------------------------------
class SpectrogramPallas:
    """JAX/Pallas re-implementation of Spectrogram (modes: 'ReIm' | 'AbsArgRatio').

    Input x: (M=2, num_samples) float32 -- mics first (the batch axis nnAudio's STFT sees).
    ReIm output:        (M, freq_bins, T, 2)   (nnAudio output_format='Complex')
    AbsArgRatio output: (freq_bins, T, 2)      (ratio, phase difference)
    """

    def __init__(self, params: FrameParams, mode: str, t_tile: int = 512,
                 compute_dtype=jnp.float32) -> None:
        assert mode in ['ReIm', 'AbsArgRatio'], \
            'Error: unknown `mode` in Spectrogram, Use ReIm | AbsArgRatio'
        self.fp = params
        self.mode = mode
        self.n_fft = params.window_sa
        self.hop = params.hop_sa
        self.freq_bins = params.freq_bins
        self.t_tile = t_tile
        # compute_dtype=jnp.bfloat16 gives 2-4x MXU throughput (v6e/v7x) but loosens the
        # phase path; kept f32 by default for bit-level parity with the reference.
        self.compute_dtype = compute_dtype

        wcos, wsin = make_stft_kernels(self.n_fft, self.freq_bins, params.fs)
        if mode == 'ReIm':
            # fuse the imag negation into the weights: cols [F,2F) directly give im = -sin_conv
            W = np.concatenate([wcos, -wsin], axis=0)        # (2F, n_fft)
        else:
            # AbsArgRatio only needs |.| (sign-free) and atan2(sin_conv, cos_conv)
            W = np.concatenate([wcos, wsin], axis=0)         # (2F, n_fft)
        self.wT = jnp.asarray(W.T)                           # (n_fft, 2F), resident in VMEM

    # ---- center=True reflect padding + frame extraction (XLA glue) ----
    def _frames(self, x):
        pad = self.n_fft // 2
        xp = jnp.pad(x, ((0, 0), (pad, pad)), mode='reflect')
        T = (xp.shape[1] - self.n_fft) // self.hop + 1
        idx = self.hop * np.arange(T)[:, None] + np.arange(self.n_fft)[None, :]
        frames = xp[:, idx]                                  # (M, T, n_fft) -- no transpose
        return frames, T

    def __call__(self, x):
        frames, T = self._frames(x)
        M = frames.shape[0]
        F = self.freq_bins
        n_fft = self.n_fft

        # time tiling: T on sublanes (multiple of 8), 2F = lane-dense output width
        t_tile = self.t_tile if T >= self.t_tile else _round_up(T, 8)
        n_t = pl.cdiv(T, t_tile)
        T_pad = n_t * t_tile
        if T_pad != T:
            frames = jnp.pad(frames, ((0, 0), (0, T_pad - T), (0, 0)))
        frames = frames.astype(self.compute_dtype)
        wT = self.wT.astype(self.compute_dtype)

        if self.mode == 'ReIm':
            out = pl.pallas_call(
                _stft_fused_kernel,
                out_shape=jax.ShapeDtypeStruct((M, T_pad, 2 * F), jnp.float32),
                grid_spec=pltpu.PrefetchScalarGridSpec(
                    num_scalar_prefetch=0,
                    grid=(M, n_t),
                    in_specs=[
                        pl.BlockSpec((None, t_tile, n_fft), lambda m, t: (m, t, 0)),
                        pl.BlockSpec((n_fft, 2 * F), lambda m, t: (0, 0)),
                    ],
                    out_specs=pl.BlockSpec((None, t_tile, 2 * F), lambda m, t: (m, t, 0)),
                ),
                compiler_params=pltpu.CompilerParams(
                    dimension_semantics=("parallel", "parallel")),
            )(frames, wT)
            out = out[:, :T, :]                               # drop time padding
            re = out[:, :, :F]                                # (M, T, F)
            im = out[:, :, F:]                                # already = -sin conv
            # match nnAudio 'Complex' layout (M, F, T, 2); split/transpose is cheap XLA glue
            return jnp.stack((re, im), axis=-1).transpose(0, 2, 1, 3)

        # mode == 'AbsArgRatio'
        out = pl.pallas_call(
            _abs_arg_ratio_kernel,
            out_shape=jax.ShapeDtypeStruct((T_pad, 2 * F), jnp.float32),
            grid_spec=pltpu.PrefetchScalarGridSpec(
                num_scalar_prefetch=0,
                grid=(n_t,),
                in_specs=[
                    pl.BlockSpec((2, t_tile, n_fft), lambda t: (0, t, 0)),
                    pl.BlockSpec((n_fft, 2 * F), lambda t: (0, 0)),
                ],
                out_specs=pl.BlockSpec((t_tile, 2 * F), lambda t: (t, 0)),
            ),
            compiler_params=pltpu.CompilerParams(
                dimension_semantics=("parallel",)),
        )(frames, wT)
        out = out[:T]
        ratio = out[:, :F].T                                  # (F, T)
        pdiff = out[:, F:].T
        return jnp.stack((ratio, pdiff), axis=-1)             # (F, T, 2)


# ------------------------------- pure-JAX reference ---------------------------------
def _reference(frames, wcos, wsin, mode):
    # frames: (M, T, n_fft)
    hp = jax.lax.Precision.HIGHEST
    re = jnp.einsum('fn,mtn->mft', wcos, frames, precision=hp)
    im = -jnp.einsum('fn,mtn->mft', wsin, frames, precision=hp)
    if mode == 'ReIm':
        return jnp.stack((re, im), axis=-1)
    l_re, l_im, r_re, r_im = re[0], im[0], re[1], im[1]
    eps = 1e-08
    mag_ref = jnp.sqrt(l_re ** 2 + l_im ** 2)
    mag_right = jnp.sqrt(r_re ** 2 + r_im ** 2)
    ratio = mag_right / (mag_ref + eps)
    pdiff = jnp.arctan2(-r_im + 0.0, r_re) - jnp.arctan2(-l_im + 0.0, l_re)
    return jnp.stack((ratio, pdiff), axis=-1)


# --------------------------------------- main ---------------------------------------
if __name__ == "__main__":
    # window_sa = 0.008 * 16000 = 128 (n_fft), hop_sa = 64, freq_bins = 64
    fp = FrameParams(window_sec=0.008, overlap=0.5, freq_bins=64, fs=16000)

    key = jax.random.PRNGKey(0)
    k1, k2 = jax.random.split(key)

    wcos_np, wsin_np = make_stft_kernels(fp.window_sa, fp.freq_bins, fp.fs)
    wcos = jnp.asarray(wcos_np)
    wsin = jnp.asarray(wsin_np)

    spec_reim = SpectrogramPallas(fp, 'ReIm')
    spec_ratio = SpectrogramPallas(fp, 'AbsArgRatio')

    def check(x, T):
        out_reim = jax.block_until_ready(spec_reim(x))        # (2, 64, T, 2)
        out_ratio = jax.block_until_ready(spec_ratio(x))      # (64, T, 2)
        assert out_reim.shape == (2, fp.freq_bins, T, 2), out_reim.shape
        assert out_ratio.shape == (fp.freq_bins, T, 2), out_ratio.shape

        frames, _ = spec_reim._frames(x)
        ref_reim = _reference(frames, wcos, wsin, 'ReIm')
        ref_ratio = _reference(frames, wcos, wsin, 'AbsArgRatio')

        np.testing.assert_allclose(np.asarray(out_reim), np.asarray(ref_reim),
                                   rtol=1e-2, atol=1e-2)
        np.testing.assert_allclose(np.asarray(out_ratio[..., 0]),
                                   np.asarray(ref_ratio[..., 0]),
                                   rtol=1e-2, atol=1e-2)
        # phase is only defined mod 2*pi (branch-cut bins can flip sign numerically)
        perr = np.asarray(out_ratio[..., 1]) - np.asarray(ref_ratio[..., 1])
        perr = (perr + np.pi) % (2.0 * np.pi) - np.pi
        np.testing.assert_allclose(perr, 0.0, atol=1e-2)

    # small case: T = 960 // 64 + 1 = 16 frames (single time tile, sublane-padded)
    x_small = jax.random.normal(k1, (2, 960), dtype=jnp.float32)
    check(x_small, 16)

    # larger case: T = 63936 // 64 + 1 = 1000 frames -> two 512-frame time tiles + padding
    x_big = jax.random.normal(k2, (2, 63936), dtype=jnp.float32)
    check(x_big, 1000)

    print("KERNEL_OK")
</pallas_src>

<mosaic_0001>
module attributes {stable_mosaic.version = 11 : i64} {
  func.func @_stft_fused_kernel(%arg0: i32, %arg1: i32, %arg2: memref<1x16x128xf32, #tpu.memory_space<vmem>>, %arg3: memref<128x128xf32, #tpu.memory_space<vmem>>, %arg4: memref<1x16x128xf32, #tpu.memory_space<vmem>>) attributes {dimension_semantics = [#tpu.dimension_semantics<parallel>, #tpu.dimension_semantics<parallel>], iteration_bounds = array<i64: 2, 1>, scalar_prefetch = 0 : i64, scratch_operands = 0 : i64, tpu.core_type = #tpu.core_type<tc>, window_params = [{transform_indices = @transform_0, window_bounds = array<i64: 1, 16, 128>}, {pipeline_mode = #tpu.pipeline_mode<synchronous>, transform_indices = @transform_1, window_bounds = array<i64: 128, 128>}, {transform_indices = @transform_2, window_bounds = array<i64: 1, 16, 128>}]} {
    %c0 = arith.constant 0 : index
    %c0_0 = arith.constant 0 : index
    %c0_1 = arith.constant 0 : index
    %0 = vector.load %arg2[%c0, %c0_0, %c0_1] : memref<1x16x128xf32, #tpu.memory_space<vmem>>, vector<1x16x128xf32>
    %1 = vector.shape_cast %0 : vector<1x16x128xf32> to vector<16x128xf32>
    %c0_2 = arith.constant 0 : index
    %c0_3 = arith.constant 0 : index
    %2 = vector.load %arg3[%c0_2, %c0_3] : memref<128x128xf32, #tpu.memory_space<vmem>>, vector<128x128xf32>
    %cst = arith.constant dense<0.000000e+00> : vector<16x128xf32>
    %3 = tpu.matmul %1, %2, %cst {dimension_numbers = #tpu.dot_dimension_numbers<[1], [0], [0], [1], [0, 0, 1, 1], [], []>} : vector<16x128xf32>, vector<128x128xf32>, vector<16x128xf32> -> vector<16x128xf32>
    %c0_4 = arith.constant 0 : index
    %c0_5 = arith.constant 0 : index
    %c0_6 = arith.constant 0 : index
    %4 = vector.load %arg4[%c0_4, %c0_5, %c0_6] : memref<1x16x128xf32, #tpu.memory_space<vmem>>, vector<1x16x128xf32>
    %5 = vector.shape_cast %4 : vector<1x16x128xf32> to vector<16x128xf32>
    %6 = vector.shape_cast %3 : vector<16x128xf32> to vector<1x16x128xf32>
    tpu.vector_store %arg4[%c0_4, %c0_5, %c0_6], %6 {strides = array<i32>} : memref<1x16x128xf32, #tpu.memory_space<vmem>>, vector<1x16x128xf32>,
    return
  }
  func.func @transform_0(%arg0: i32, %arg1: i32) -> (i32, i32, i32) {
    %c0_i32 = arith.constant 0 : i32
    %c0_i32_0 = arith.constant 0 : i32
    return %arg0, %arg1, %c0_i32 : i32, i32, i32
  }
  func.func @transform_1(%arg0: i32, %arg1: i32) -> (i32, i32) {
    %c0_i32 = arith.constant 0 : i32
    %c0_i32_0 = arith.constant 0 : i32
    %c0_i32_1 = arith.constant 0 : i32
    return %c0_i32, %c0_i32_0 : i32, i32
  }
  func.func @transform_2(%arg0: i32, %arg1: i32) -> (i32, i32, i32) {
    %c0_i32 = arith.constant 0 : i32
    %c0_i32_0 = arith.constant 0 : i32
    return %arg0, %arg1, %c0_i32 : i32, i32, i32
  }
}

</mosaic_0001>

<bundles_post_ra>
// kernel: tpu_custom_call.1
= control target key start
LH: loop header
LB: loop body
LE: loop exit
PB: predicated region body
PF: predicated region fallthrough
CT: control target
= control target key end

     0   :  { %7 = vsyncpa [#allocation3], 0  ;;  %s987_s0 = inlined_call_operand.hbm [shape: f32[2,16,128], index: 0, kind: input, shape index: {}]   ;;  %s988_s1 = inlined_call_operand.hbm [shape: f32[128,128], index: 1, kind: input, shape index: {}]   ;;  %s989_s2 = inlined_call_operand.hbm [shape: f32[2,16,128], index: 2, kind: output, shape index: {}]  }
   0x1   :  { %9 = vsyncpa [#allocation3 + $0x1], 0 }
   0x2   :  { %10 = vsyncpa [#allocation6], 0 }
   0x3   :  { %11 = vsyncpa [#allocation4], 0 }
   0x4   :  { %13 = vsyncpa [#allocation4 + $0x1], 0  ;;  %s754_s9 = smov 0   ;;  %s756_s10 = smov 0  }
   0x5   :  { %s758_s11 = smov 0   ;;  %s760_s12 = smov 0  }
   0x6   :  { %s762_s13 = smov 0   ;;  %s764_s14 = smov 0  }
   0x7 LB: > { %s405_s15 = sadd.s32 4294967295, %s730_s14   ;;  %s406_s16 = sadd.s32 4294967294, %s730_s14   ;;  %s730_s14 = sphi %s764_s14, %s19_s14   ;;  %s726_s13 = sphi %s762_s13, %s1013_s13   ;;  %s722_s12 = sphi %s760_s12, %s1012_s12   ;;  %s718_s11 = sphi %s758_s11, %s1011_s11   ;;  %s714_s10 = sphi %s756_s10, %s1010_s10   ;;  %s710_s9 = sphi %s754_s9, %s1009_s9  }
   0x8   : > { %p53_p0 = scmp.ne.s32.totalorder %s714_s10, %s710_s9  ;;  %p788_p1 = scmp.eq.s32.totalorder %s405_s15, 0 }
   0x9   : > { %p792_p2 = scmp.eq.s32.totalorder %s405_s15, 1  ;;  %p106_p3 = scmp.eq.s32.totalorder %s406_s16, 1 }
   0xa   : > { %s994_s17 = scalar_select %p788_p1, 1, 0 }
   0xb   : > { %s995_s18 = scalar_select %p792_p2, 1, 0 }
   0xc   : > { %p798_p4 = por %p788_p1, %p53_p0  ;;  %p407_p5 = scmp.ge.s32.totalorder %s730_s14, 1 }
   0xd   : > { %p803_p6 = por %p106_p3, %p53_p0  ;;  %p113_p7 = scmp.lt.s32.totalorder %s730_s14, 3 }
   0xe   : > { %s996_s19 = scalar_select %p798_p4, 1, 0 }
   0xf   : > { %s997_s20 = scalar_select %p803_p6, 1, 0 }
  0x10   : > { %p808_p8 = pnand %p407_p5, %p113_p7  ;;  %s732_s22 = smov [#allocation5]  }
  0x11   : > { %s125_s23 = sshll.u32 %s732_s22, 4  ;;  %s31_s25 = sadd.s32 1, %s726_s13  ;;  %s126_s23 = int_to_ptr.vmem [resolvable:$true] %s125_s23 }
  0x12   : > { %s998_s21 = scalar_select %p808_p8, 1, 0 }
  0x13   : > { %p517_p9 = pneg %p808_p8  ;;  %s586_s28 = scalar_lea.hbm %s988_s1, 2048 }
  0x14   : > { %p587_p12 = scmp.ne.s32.totalorder %s988_s1, %s586_s28  ;;  %p593_p5 = scmp.lt.u32.totalorder %s586_s28, %s988_s1 }
  0x15   : > { %p817_p11 = pnand %p517_p9, %p788_p1 }
  0x17   : > { %p588_p13 = pneg %p817_p11 }
  0x19   : > { %p589_p0 = pnand %p588_p13, %p587_p12 }
  0x1b   : > { %p590_p3 = pneg %p589_p0 }
  0x1d   : > { %p595_p7 = pnand %p593_p5, %p590_p3 }
  0x1f   : > { %598 = shalt.err (!%p595_p7)
}
  0x20   : > { %s599_s5 = scalar_lea.vmem %s126_s23, 2048  ;;  %p607_p1 = scmp.lt.s32.totalorder %s126_s23, %s126_s23 }
  0x21   : > { %p600_p9 = scmp.ne.s32.totalorder %s126_s23, %s599_s5  ;;  %p608_p4 = scmp.lt.s32.totalorder %s599_s5, %s599_s5 }
  0x23   : > { %p602_p10 = pnand %p600_p9, %p588_p13  ;;  %p609_p8 = por %p608_p4, %p607_p1 }
  0x25   : > { %p603_p6 = pneg %p602_p10 }
  0x27   : > { %p610_p2 = pnand %p609_p8, %p603_p6 }
  0x29   : > { %613 = shalt.err (!%p610_p2)
}
  0x2a   : > { %s733_s6 = smov 128   ;;  %s734_s7 = smov 8  }
  0x2b   : > { %520 = dma.hbm_to_vmem [thread:$0]  (!%p817_p11), %s988_s1, 2048, %s126_s23, [#allocation6], %s733_s6, %s733_s6, %s734_s7  }
  0x2c   : > { %p33_p1 = scmp.ge.s32.totalorder %s31_s25, 2  ;;  %s40_s16 = sadd.s32 1, %s718_s11 }
  0x2d   : > { %p47_p2 = scmp.ne.s32.totalorder %s718_s11, %s714_s10  ;;  %p48_p4 = scmp.eq.s32.totalorder %s730_s14, 0 }
  0x2e   : > { %s1015_s25 = smov (%p33_p1, %s31_s25), 0  ;;  %p1001_p8 = scmp.ne.s32.totalorder %s995_s18, 0 }
  0x2f   : > { %p847_p6 = por %p48_p4, %p47_p2  ;;  %s35_s26 = ssub.s32 %s726_s13, %s1015_s25 }
  0x30   : > { %p853_p10 = por %p1001_p8, %p47_p2  ;;  %p530_p12 = scmp.lt.s32.totalorder %s730_s14, 2 }
  0x31   : > { %p38_p11 = scmp.eq.s32.totalorder %s35_s26, 0  ;;  %s139_s23 = sand.u32 1, %s718_s11  }
  0x32   : > { %s410_s27 = sshll.u32 %s139_s23, 4  ;;  %s422_s29 = sshll.u32 %s726_s13, 8 }
  0x33   : > { %s862_s28 = scalar_select %p38_p11, %s718_s11, %s40_s16  }
  0x34   : > { %s868_s4 = scalar_lea.hbm %s987_s0, %s422_s29  ;;  %s143_s18 = scalar_lea.vmem [#allocation2], %s410_s27 }
  0x35   : > { %s152_s5 = sshll.u32 %s143_s18, 4  ;;  %p874_p13 = pnand %p530_p12, %p847_p6  ;;  %s870_s5 = int_to_ptr.vmem [resolvable:$true] %s152_s5 }
  0x36   : > { %s878_s15 = scalar_lea.sflag [#allocation3], %s139_s23  ;;  %s614_s16 = scalar_lea.hbm %s868_s4, 256 }
  0x37   : > { %p615_p0 = scmp.ne.s32.totalorder %s868_s4, %s614_s16  ;;  %p616_p3 = pneg %p874_p13 }
  0x38   : > { %s619_s22 = scalar_lea.hbm %s987_s0, 512  ;;  %p620_p9 = scmp.lt.u32.totalorder %s868_s4, %s987_s0 }
  0x39   : > { %p617_p5 = pnand %p616_p3, %p615_p0  ;;  %p621_p1 = scmp.lt.u32.totalorder %s619_s22, %s614_s16 }
  0x3a   : > { %p623_p4 = scmp.lt.u32.totalorder %s614_s16, %s868_s4 }
  0x3b   : > { %p618_p7 = pneg %p617_p5  ;;  %p622_p2 = por %p621_p1, %p620_p9 }
  0x3d   : > { %p624_p6 = por %p623_p4, %p622_p2 }
  0x3f   : > { %p625_p8 = pnand %p624_p6, %p618_p7 }
  0x41   : > { %628 = shalt.err (!%p625_p8)
}
  0x42   : > { %s629_s23 = scalar_lea.vmem %s870_s5, 256  ;;  %s735_s3 = smov [#allocation2]  }
  0x43   : > { %p630_p12 = scmp.ne.s32.totalorder %s870_s5, %s629_s23  ;;  %s634_s18 = sshll.u32 %s735_s3, 4  ;;  %s635_s18 = int_to_ptr.vmem [resolvable:$false] %s634_s18 }
  0x44   : > { %s636_s26 = scalar_lea.vmem %s635_s18, 512  ;;  %p637_p5 = scmp.lt.s32.totalorder %s870_s5, %s635_s18 }
  0x45   : > { %p632_p11 = pnand %p630_p12, %p616_p3  ;;  %p638_p9 = scmp.lt.s32.totalorder %s636_s26, %s629_s23 }
  0x47   : > { %p633_p0 = pneg %p632_p11  ;;  %p639_p1 = por %p638_p9, %p637_p5 }
  0x49   : > { %p640_p2 = pnand %p639_p1, %p633_p0 }
  0x4b   : > { %643 = shalt.err (!%p640_p2)
}
  0x4c   : > { %524 = dma.hbm_to_vmem [thread:$0]  (!%p874_p13), %s868_s4, 256, %s870_s5, %s878_s15, %s733_s6, %s733_s6, %s734_s7  }
  0x4d   : > { %p1004_p3 = scmp.ne.s32.totalorder %s998_s21, 0 }
  0x4e   : > { %s912_s16 = sand.u32 (!%p1004_p3), 1, %s714_s10   ;;  %p1005_p7 = scmp.ne.s32.totalorder (!%p1004_p3), %s996_s19, 0 }
  0x4f   : > { %164 = sbr.rel (%p1004_p3) target bundleno = 353 (0x161), region = 28  ;;  %s414_s27 = sshll.u32 (!%p1004_p3), %s912_s16, 4 }
  0x50   : > { %s167_s22 = scalar_lea.sflag (!%p1004_p3), [#allocation3], %s912_s16  ;;  %s918_s8 = scalar_lea.vmem (!%p1004_p3), [#allocation2], %s414_s27 }
  0x56   : > { %697 = dma.done.wait (%p1005_p7), %s167_s22, 256  }
  0x57   : > { %699 = vsyncadd (%p1005_p7), %s167_s22, 4294967040  ;;  %p1006_p13 = scmp.ne.s32.totalorder %s994_s17, 0 }
  0x59   : > { %701 = dma.done.wait (%p1006_p13), [#allocation6], 2048  }
  0x5a   : > { %703 = vsyncadd (%p1006_p13), [#allocation6], 4294965248  ;;  %v199_v0 = vld [vmem:[#allocation5] sm:$0xff]  ;;  %v200_v1 = vld [vmem:[#allocation5 + $0x8] sm:$0xff]  ;;  %s194_s17 = scalar_lea.vmem [#allocation7], %s414_s27  ;;  %s423_s21 = sshll.u32 %s722_s12, 8 }
  0x5b   : > { %v201_v2 = vld [vmem:[#allocation5 + $0x10] sm:$0xff]  ;;  %v477_v3 = vpack.c.bf16 %v200_v1, %v199_v0  ;;  %v202_v4 = vld [vmem:[#allocation5 + $0x18] sm:$0xff]  ;;  %v203_v6 = vld [vmem:[#allocation5 + $0x20] sm:$0xff]  ;;  %s308_s19 = sshll.u32 %s194_s17, 4  ;;  %s938_s4 = scalar_lea.hbm %s989_s2, %s423_s21  ;;  %s933_s19 = int_to_ptr.vmem [resolvable:$true] %s308_s19 }
  0x5c   : > { %v481_v5 = vpack.c.bf16 %v202_v4, %v201_v2  ;;  %v204_v7 = vld [vmem:[#allocation5 + $0x28] sm:$0xff]  ;;  %v197_v9 = vld [vmem:[%s918_s8] sm:$0xff]  ;;  %v206_v11 = vld [vmem:[#allocation5 + $0x38] sm:$0xff]  ;;  %s293_s5 = scalar_lea.sflag [#allocation4], %s912_s16  ;;  %s644_s15 = scalar_lea.vmem %s933_s19, 256 }
  0x5d   : > { %478 = vmatprep.subr.bf16.mxu0 %v477_v3  ;;  %v485_v8 = vpack.c.bf16 %v204_v7, %v203_v6  ;;  %v205_v10 = vld [vmem:[#allocation5 + $0x30] sm:$0xff]  ;;  %474 = vmatprep.mubr.f32.mxu0 %v197_v9  ;;  %v207_v13 = vld [vmem:[#allocation5 + $0x40] sm:$0xff]  ;;  %v208_v14 = vld [vmem:[#allocation5 + $0x48] sm:$0xff]  ;;  %p645_p4 = scmp.ne.s32.totalorder %s933_s19, %s644_s15  ;;  %s736_s12 = smov [#allocation7]  }
  0x5e   : > { %480 = vmatpush3.bf16.msra.mxu0 %v477_v3  ;;  %v489_v12 = vpack.c.bf16 %v206_v11, %v205_v10  ;;  %v493_v15 = vpack.c.bf16 %v208_v14, %v207_v13  ;;  %v209_v16 = vld [vmem:[#allocation5 + $0x50] sm:$0xff]  ;;  %v210_v17 = vld [vmem:[#allocation5 + $0x58] sm:$0xff]  ;;  %v211_v19 = vld [vmem:[#allocation5 + $0x60] sm:$0xff]  ;;  %s648_s29 = sshll.u32 %s736_s12, 4  ;;  %s649_s29 = int_to_ptr.vmem [resolvable:$false] %s648_s29 }
  0x5f   : > { %482 = vmatprep.subr.bf16.mxu0 %v481_v5  ;;  %v497_v18 = vpack.c.bf16 %v210_v17, %v209_v16  ;;  %v212_v20 = vld [vmem:[#allocation5 + $0x68] sm:$0xff]  ;;  %v213_v22 = vld [vmem:[#allocation5 + $0x70] sm:$0xff]  ;;  %v214_v23 = vld [vmem:[#allocation5 + $0x78] sm:$0xff]  ;;  %p646_p6 = pnand %p645_p4, %p853_p10  ;;  %s650_s30 = scalar_lea.vmem %s649_s29, 512 }
  0x60   : > { %v501_v21 = vpack.c.bf16 %v212_v20, %v211_v19  ;;  %v505_v24 = vpack.c.bf16 %v214_v23, %v213_v22  ;;  %v198_v25 = vld [vmem:[%s918_s8 + $0x8] sm:$0xff]  ;;  %p651_p12 = scmp.lt.s32.totalorder %s933_s19, %s649_s29  ;;  %p652_p11 = scmp.lt.s32.totalorder %s650_s30, %s644_s15 }
  0x61   : > { %p647_p8 = pneg %p646_p6 }
  0x62   : > { %484 = vmatpush3.bf16.msra.mxu0 %v481_v5  ;;  %p653_p0 = por %p652_p11, %p651_p12 }
  0x63   : > { %486 = vmatprep.subr.bf16.mxu0 %v485_v8 }
  0x64   : > { %p654_p5 = pnand %p653_p0, %p647_p8 }
  0x66   : > { %488 = vmatpush3.bf16.msra.mxu0 %v485_v8 }
  0x67   : > { %490 = vmatprep.subr.bf16.mxu0 %v489_v12 }
  0x6a   : > { %492 = vmatpush3.bf16.msra.mxu0 %v489_v12 }
  0x6b   : > { %494 = vmatprep.subr.bf16.mxu0 %v493_v15 }
  0x6e   : > { %496 = vmatpush3.bf16.msra.mxu0 %v493_v15 }
  0x6f   : > { %498 = vmatprep.subr.bf16.mxu0 %v497_v18 }
  0x72   : > { %500 = vmatpush3.bf16.msra.mxu0 %v497_v18 }
  0x73   : > { %502 = vmatprep.subr.bf16.mxu0 %v501_v21 }
  0x76   : > { %504 = vmatpush3.bf16.msra.mxu0 %v501_v21 }
  0x77   : > { %506 = vmatprep.subr.bf16.mxu0 %v505_v24 }
  0x7a   : > { %508 = vmatpush3.bf16.msra.mxu0 %v505_v24 }
  0x7d   : > { %475 = vmatmul.mubr.f32.vlgmr.msra.gmra.mrb[0].mxu0 %v198_v25 }
 0x150   : > { %v476_v26 = vpop.f32.mrb[0].mxu0 }
 0x151   : > { %291 = vst [vmem:[%s194_s17 + $0x8] sm:$0xff] %v476_v26  ;;  %v281_v27 = vpop.f32.mrb[1].mxu0 }
 0x152   : > { %290 = vst [vmem:[%s194_s17] sm:$0xff] %v281_v27 }
 0x153   : > { %657 = shalt.err (!%p654_p5)
}
 0x154   : > { %s658_s23 = scalar_lea.hbm %s938_s4, 256  ;;  %s662_s26 = scalar_lea.hbm %s989_s2, 512 }
 0x155   : > { %p659_p9 = scmp.ne.s32.totalorder %s938_s4, %s658_s23  ;;  %p663_p3 = scmp.lt.u32.totalorder %s938_s4, %s989_s2 }
 0x156   : > { %p664_p7 = scmp.lt.u32.totalorder %s662_s26, %s658_s23  ;;  %p666_p4 = scmp.lt.u32.totalorder %s658_s23, %s938_s4 }
 0x157   : > { %p660_p1 = pnand %p659_p9, %p853_p10 }
 0x158   : > { %p665_p13 = por %p664_p7, %p663_p3 }
 0x159   : > { %p661_p2 = pneg %p660_p1 }
 0x15a   : > { %p667_p6 = por %p666_p4, %p665_p13 }
 0x15c   : > { %p668_p8 = pnand %p667_p6, %p661_p2 }
 0x15e   : > { %671 = shalt.err (!%p668_p8)
}
 0x15f   : > { %s737_s8 = smov 128   ;;  %s738_s17 = smov 8  }
 0x160   : > { %515 = dma.vmem_to_hbm [thread:$0]  (%p853_p10), %s933_s19, 256, %s938_s4, %s293_s5, %s737_s8, %s737_s8, %s738_s17  }
 0x161 PF: > { %s323_s21 = sand.u32 1, %s710_s9   ;;  %p1007_p12 = scmp.ne.s32.totalorder %s997_s20, 0 }
 0x162   : > { %p1008_p11 = scmp.ge.s32.totalorder %s730_s14, 2  ;;  %s324_s6 = scalar_lea.sflag [#allocation4], %s323_s21 }
 0x164   : > { %p526_p0 = pnand %p1008_p11, %p1007_p12 }
 0x166   : > { %705 = dma.done.wait (!%p526_p0), %s324_s6, 256  }
 0x167   : > { %707 = vsyncadd (!%p526_p0), %s324_s6, 4294967040  ;;  %s19_s14 = sadd.s32 1, %s730_s14   ;;  %s1009_s9 = smov %s714_s10 }
 0x168   : > { %p16_p5 = scmp.ge.s32.totalorder %s19_s14, 4   ;;  %s1010_s10 = smov %s718_s11 }
 0x169   : > { %s1011_s11 = smov %s862_s28  ;;  %s1012_s12 = smov %s726_s13 }
 0x16a   : > { %s1013_s13 = smov %s1015_s25  ;;  %18 = sbr.rel (!%p16_p5) target bundleno = 7 (0x7), region = 77 }
 0x171   :  { %329 = vsyncpa [#allocation3], 1 }
 0x172   :  { %331 = vsyncpa [#allocation3 + $0x1], 1 }
 0x173   :  { %332 = vsyncpa [#allocation6], 1 }
 0x174   :  { %333 = vsyncpa [#allocation4], 1 }
 0x175   :  { %335 = vsyncpa [#allocation4 + $0x1], 1 }

</bundles_post_ra>
